<compile_context>
chip_gen: v7x
topology: tpu7x:2x2x1
jax: 0.10.0
libtpu: 0.0.40
codegen_flags: <defaults>
</compile_context>

<pallas_src>
import functools

import jax
import jax.numpy as jnp
from jax import lax
from jax.experimental import pallas as pl
from jax.experimental.pallas import tpu as pltpu


def _round_up(x, m):
    return (x + m - 1) // m * m


def _elementwise_dtype():
    """bf16 elementwise on chips with bf16 VPU/EUP (v6e/v7x), f32 otherwise."""
    try:
        kind = jax.devices()[0].device_kind.lower()
    except Exception:  # pragma: no cover - defensive
        kind = ""
    if any(v in kind for v in ("v2", "v3", "v4", "v5")):
        return jnp.float32
    return jnp.bfloat16


# ---------------------------------------------------------------------------
# Kernel
# ---------------------------------------------------------------------------
def mu_actor_kernel(obs_ref, w1_ref, b1_ref, g_ref, beta_ref,
                    w2_ref, b2_ref, w3_ref, b3_ref,
                    out_ref, *, hidden_dim, action_dim, ew_dtype):
    # ---- Linear 1: [TB, obs_pad] @ [obs_pad, H_PAD] (bf16 MXU, f32 acc) ----
    x = obs_ref[...].astype(jnp.bfloat16)
    h = jnp.dot(x, w1_ref[...], preferred_element_type=jnp.float32) + b1_ref[...]

    # ---- LayerNorm over the TRUE hidden_dim columns (padded cols are 0) ----
    # One-pass variance: var = E[h^2] - mean^2 -> padded zero columns do not
    # perturb either reduction (single pair of XLU reductions).
    inv_h = 1.0 / float(hidden_dim)
    mean = jnp.sum(h, axis=-1, keepdims=True) * inv_h
    ex2 = jnp.sum(h * h, axis=-1, keepdims=True) * inv_h
    var = jnp.maximum(ex2 - mean * mean, 0.0)
    h = (h - mean) * lax.rsqrt(var + 1e-5)
    # gamma/beta are zero in padded columns -> padded lanes stay exactly 0.
    h = h * g_ref[...] + beta_ref[...]

    # ---- Tanh (EUP); bf16 on v6e/v7x, f32 on v5e ----
    h = jnp.tanh(h.astype(ew_dtype))

    # ---- Linear 2 + ReLU ----
    h2 = jnp.dot(h.astype(jnp.bfloat16), w2_ref[...],
                 preferred_element_type=jnp.float32) + b2_ref[...]
    h2 = jnp.maximum(h2.astype(ew_dtype), 0.0)

    # ---- Linear 3 -> [TB, OUT_PAD] = [mu | log_std | 0-pad] ----
    out = jnp.dot(h2.astype(jnp.bfloat16), w3_ref[...],
                  preferred_element_type=jnp.float32) + b3_ref[...]

    # Narrow to the 2*A real lanes (lane 0.. offset, no shuffle) before the
    # clamp+exp lane-select, so EUP/VPU work only touches useful lanes.
    narrow = out[:, :2 * action_dim]
    col = lax.broadcasted_iota(jnp.int32, narrow.shape, 1)
    std_like = jnp.exp(jnp.clip(narrow, -10.0, 2.0))
    narrow = jnp.where(col >= action_dim, std_like, narrow)

    # Narrow store: block last dim == full output array dim (2*A).
    out_ref[...] = narrow.astype(out_ref.dtype)


# ---------------------------------------------------------------------------
# Wrapper
# ---------------------------------------------------------------------------
def mu_actor_forward(obs, params, *, batch_tile=None):
    """Returns (mu, std) — the parameters of utils.TruncatedNormal(mu, std)."""
    B, obs_dim = obs.shape
    hidden_dim = params["hidden_dim"]
    action_dim = params["action_dim"]
    obs_pad = params["w1"].shape[0]
    h_pad = params["w1"].shape[1]
    out_pad = params["w3"].shape[1]
    out_dim = 2 * action_dim

    if batch_tile is None:
        if B <= 1024:
            # Small batch: one big tile (amortizes the ~0.35 us per-step cost).
            batch_tile = _round_up(B, 8)
        else:
            # Large batch: big tiles, but guarantee >= 2 grid steps so the
            # "parallel" batch axis shards across v7x's two TensorCores.
            batch_tile = min(1024, _round_up((B + 1) // 2, 8))
    b_pad = _round_up(B, batch_tile)
    if b_pad != B or obs_pad != obs_dim:
        obs = jnp.pad(obs, ((0, b_pad - B), (0, obs_pad - obs_dim)))

    grid = (b_pad // batch_tile,)
    ew_dtype = _elementwise_dtype()
    kernel = functools.partial(
        mu_actor_kernel, hidden_dim=hidden_dim, action_dim=action_dim,
        ew_dtype=ew_dtype)

    const = lambda i: (0, 0)   # weights / biases resident across grid steps
    out = pl.pallas_call(
        kernel,
        out_shape=jax.ShapeDtypeStruct((b_pad, out_dim), jnp.float32),
        grid=grid,
        in_specs=[
            pl.BlockSpec((batch_tile, obs_pad), lambda i: (i, 0)),  # obs
            pl.BlockSpec((obs_pad, h_pad), const),                  # w1 (bf16)
            pl.BlockSpec((1, h_pad), const),                        # b1
            pl.BlockSpec((1, h_pad), const),                        # gamma
            pl.BlockSpec((1, h_pad), const),                        # beta
            pl.BlockSpec((h_pad, h_pad), const),                    # w2 (bf16)
            pl.BlockSpec((1, h_pad), const),                        # b2
            pl.BlockSpec((h_pad, out_pad), const),                  # w3 (bf16)
            pl.BlockSpec((1, out_pad), const),                      # b3
        ],
        out_specs=pl.BlockSpec((batch_tile, out_dim), lambda i: (i, 0)),
        compiler_params=pltpu.CompilerParams(
            dimension_semantics=("parallel",)),
    )(obs, params["w1"], params["b1"], params["gamma"], params["beta"],
      params["w2"], params["b2"], params["w3"], params["b3"])

    mu = out[:B, :action_dim]
    std = out[:B, action_dim:]
    return mu, std


# ---------------------------------------------------------------------------
# Parameters (synthetic, deterministic)
# ---------------------------------------------------------------------------
def init_params(key, obs_dim, action_dim, hidden_dim):
    """Unpadded f32 parameters, weights stored as [in, out] (== x @ W.T in torch)."""
    ks = jax.random.split(key, 6)
    s1 = 1.0 / jnp.sqrt(obs_dim)
    s2 = 1.0 / jnp.sqrt(hidden_dim)
    return {
        "w1": jax.random.normal(ks[0], (obs_dim, hidden_dim), jnp.float32) * s1,
        "b1": jax.random.normal(ks[1], (hidden_dim,), jnp.float32) * 0.1,
        "gamma": 1.0 + jax.random.normal(ks[2], (hidden_dim,), jnp.float32) * 0.1,
        "beta": jax.random.normal(ks[3], (hidden_dim,), jnp.float32) * 0.1,
        "w2": jax.random.normal(ks[4], (hidden_dim, hidden_dim), jnp.float32) * s2,
        "b2": jnp.zeros((hidden_dim,), jnp.float32),
        "w3": jax.random.normal(ks[5], (hidden_dim, 2 * action_dim), jnp.float32) * s2,
        "b3": jnp.zeros((2 * action_dim,), jnp.float32),
    }


def prepare_params(p, obs_dim, action_dim, hidden_dim):
    """Pad feature dims (obs_dim -> mult of 32 for bf16 K-dim packing, hidden
    and 2*A -> mult of 128) with zeros and cast weight matrices to bf16.
    Zero padding + true-H layernorm keeps the math equal to the unpadded model."""
    obs_pad = _round_up(obs_dim, 32)
    h_pad = _round_up(hidden_dim, 128)
    out_pad = _round_up(2 * action_dim, 128)

    def pad_vec(v, n):
        return jnp.pad(v, (0, n - v.shape[0])).reshape(1, n).astype(jnp.float32)

    w1 = jnp.pad(p["w1"], ((0, obs_pad - obs_dim), (0, h_pad - hidden_dim)))
    w2 = jnp.pad(p["w2"], ((0, h_pad - hidden_dim), (0, h_pad - hidden_dim)))
    w3 = jnp.pad(p["w3"], ((0, h_pad - hidden_dim), (0, out_pad - 2 * action_dim)))

    return {
        "w1": w1.astype(jnp.bfloat16),
        "w2": w2.astype(jnp.bfloat16),
        "w3": w3.astype(jnp.bfloat16),
        "b1": pad_vec(p["b1"], h_pad),
        "gamma": pad_vec(p["gamma"], h_pad),
        "beta": pad_vec(p["beta"], h_pad),
        "b2": pad_vec(p["b2"], h_pad),
        "b3": pad_vec(p["b3"], out_pad),
        "hidden_dim": hidden_dim,
        "action_dim": action_dim,
    }


# ---------------------------------------------------------------------------
# Reference (mirrors the kernel's bf16 matmul-input / f32-accumulate path and
# its elementwise dtype, so only reduction-order/one-pass-var noise remains)
# ---------------------------------------------------------------------------
def _reference(obs, p, ew_dtype):
    bf = jnp.bfloat16
    w1 = p["w1"].astype(bf)
    w2 = p["w2"].astype(bf)
    w3 = p["w3"].astype(bf)
    h = jnp.dot(obs.astype(bf), w1, preferred_element_type=jnp.float32) + p["b1"]
    mean = h.mean(-1, keepdims=True)
    var = ((h - mean) ** 2).mean(-1, keepdims=True)
    h = (h - mean) / jnp.sqrt(var + 1e-5) * p["gamma"] + p["beta"]
    h = jnp.tanh(h.astype(ew_dtype))
    h = jnp.dot(h.astype(bf), w2, preferred_element_type=jnp.float32) + p["b2"]
    h = jnp.maximum(h.astype(ew_dtype), 0.0)
    out = jnp.dot(h.astype(bf), w3, preferred_element_type=jnp.float32) + p["b3"]
    a = p["w3"].shape[1] // 2
    mu, log_std = out[:, :a], out[:, a:]
    return mu, jnp.exp(jnp.clip(log_std, -10.0, 2.0))


if __name__ == "__main__":
    B, OBS_DIM, ACTION_DIM, HIDDEN_DIM = 8, 24, 4, 32

    key = jax.random.PRNGKey(0)
    k_obs, k_par = jax.random.split(key)
    obs = jax.random.normal(k_obs, (B, OBS_DIM), jnp.float32)

    raw = init_params(k_par, OBS_DIM, ACTION_DIM, HIDDEN_DIM)
    params = prepare_params(raw, OBS_DIM, ACTION_DIM, HIDDEN_DIM)

    mu, std = mu_actor_forward(obs, params)
    jax.block_until_ready((mu, std))

    mu_ref, std_ref = _reference(obs, raw, _elementwise_dtype())
    assert mu.shape == (B, ACTION_DIM) and std.shape == (B, ACTION_DIM)
    # Tolerance covers bf16 matmul-input rounding + reduction-order + the
    # one-pass vs two-pass LayerNorm variance difference.
    assert jnp.allclose(mu, mu_ref, atol=2e-2, rtol=2e-2), "mu mismatch"
    assert jnp.allclose(std, std_ref, atol=2e-2, rtol=2e-2), "std mismatch"
    assert bool(jnp.all(std > 0.0)), "std must be positive"

    # TODO(synk): TruncatedNormal sampling/log_prob is distribution machinery
    # outside the forward hot path; the kernel returns its parameters (mu, std).
    print("KERNEL_OK")
</pallas_src>

<mosaic_0001>
module attributes {stable_mosaic.version = 11 : i64} {
  func.func @mu_actor_kernel(%arg0: i32, %arg1: memref<8x32xf32, #tpu.memory_space<vmem>>, %arg2: memref<32x128xbf16, #tpu.memory_space<vmem>>, %arg3: memref<1x128xf32, #tpu.memory_space<vmem>>, %arg4: memref<1x128xf32, #tpu.memory_space<vmem>>, %arg5: memref<1x128xf32, #tpu.memory_space<vmem>>, %arg6: memref<128x128xbf16, #tpu.memory_space<vmem>>, %arg7: memref<1x128xf32, #tpu.memory_space<vmem>>, %arg8: memref<128x128xbf16, #tpu.memory_space<vmem>>, %arg9: memref<1x128xf32, #tpu.memory_space<vmem>>, %arg10: memref<8x8xf32, #tpu.memory_space<vmem>>) attributes {dimension_semantics = [#tpu.dimension_semantics<parallel>], iteration_bounds = array<i64: 1>, scalar_prefetch = 0 : i64, scratch_operands = 0 : i64, tpu.core_type = #tpu.core_type<tc>, window_params = [{transform_indices = @transform_0, window_bounds = array<i64: 8, 32>}, {pipeline_mode = #tpu.pipeline_mode<synchronous>, transform_indices = @transform_1, window_bounds = array<i64: 32, 128>}, {pipeline_mode = #tpu.pipeline_mode<synchronous>, transform_indices = @transform_2, window_bounds = array<i64: 1, 128>}, {pipeline_mode = #tpu.pipeline_mode<synchronous>, transform_indices = @transform_3, window_bounds = array<i64: 1, 128>}, {pipeline_mode = #tpu.pipeline_mode<synchronous>, transform_indices = @transform_4, window_bounds = array<i64: 1, 128>}, {pipeline_mode = #tpu.pipeline_mode<synchronous>, transform_indices = @transform_5, window_bounds = array<i64: 128, 128>}, {pipeline_mode = #tpu.pipeline_mode<synchronous>, transform_indices = @transform_6, window_bounds = array<i64: 1, 128>}, {pipeline_mode = #tpu.pipeline_mode<synchronous>, transform_indices = @transform_7, window_bounds = array<i64: 128, 128>}, {pipeline_mode = #tpu.pipeline_mode<synchronous>, transform_indices = @transform_8, window_bounds = array<i64: 1, 128>}, {transform_indices = @transform_9, window_bounds = array<i64: 8, 8>}]} {
    %c0 = arith.constant 0 : index
    %c0_0 = arith.constant 0 : index
    %0 = vector.load %arg1[%c0, %c0_0] : memref<8x32xf32, #tpu.memory_space<vmem>>, vector<8x32xf32>
    %1 = arith.truncf %0 : vector<8x32xf32> to vector<8x32xbf16>
    %c0_1 = arith.constant 0 : index
    %c0_2 = arith.constant 0 : index
    %2 = vector.load %arg2[%c0_1, %c0_2] : memref<32x128xbf16, #tpu.memory_space<vmem>>, vector<32x128xbf16>
    %cst = arith.constant dense<0.000000e+00> : vector<8x128xf32>
    %3 = tpu.matmul %1, %2, %cst {dimension_numbers = #tpu.dot_dimension_numbers<[1], [0], [0], [1], [0, 0, 1, 1], [], []>} : vector<8x32xbf16>, vector<32x128xbf16>, vector<8x128xf32> -> vector<8x128xf32>
    %c0_3 = arith.constant 0 : index
    %c0_4 = arith.constant 0 : index
    %4 = vector.load %arg3[%c0_3, %c0_4] : memref<1x128xf32, #tpu.memory_space<vmem>>, vector<1x128xf32>
    %5 = vector.broadcast %4 : vector<1x128xf32> to vector<8x128xf32>
    %6 = arith.addf %3, %5 : vector<8x128xf32>
    %cst_5 = arith.constant dense<0.000000e+00> : vector<8xf32>
    %7 = vector.multi_reduction <add>, %6, %cst_5 [1] : vector<8x128xf32> to vector<8xf32>
    %8 = vector.shape_cast %7 : vector<8xf32> to vector<8x1xf32>
    %cst_6 = arith.constant 3.125000e-02 : f32
    %9 = vector.broadcast %cst_6 : f32 to vector<8x1xf32>
    %10 = arith.mulf %8, %9 : vector<8x1xf32>
    %11 = arith.mulf %6, %6 : vector<8x128xf32>
    %cst_7 = arith.constant dense<0.000000e+00> : vector<8xf32>
    %12 = vector.multi_reduction <add>, %11, %cst_7 [1] : vector<8x128xf32> to vector<8xf32>
    %13 = vector.shape_cast %12 : vector<8xf32> to vector<8x1xf32>
    %cst_8 = arith.constant 3.125000e-02 : f32
    %14 = vector.broadcast %cst_8 : f32 to vector<8x1xf32>
    %15 = arith.mulf %13, %14 : vector<8x1xf32>
    %16 = arith.mulf %10, %10 : vector<8x1xf32>
    %17 = arith.subf %15, %16 : vector<8x1xf32>
    %cst_9 = arith.constant 0.000000e+00 : f32
    %18 = vector.broadcast %cst_9 : f32 to vector<8x1xf32>
    %19 = arith.maximumf %17, %18 : vector<8x1xf32>
    %20 = vector.broadcast %10 : vector<8x1xf32> to vector<8x128xf32>
    %21 = arith.subf %6, %20 : vector<8x128xf32>
    %cst_10 = arith.constant 9.99999974E-6 : f32
    %22 = vector.broadcast %cst_10 : f32 to vector<8x1xf32>
    %23 = arith.addf %19, %22 : vector<8x1xf32>
    %24 = math.rsqrt %23 : vector<8x1xf32>
    %25 = vector.broadcast %24 : vector<8x1xf32> to vector<8x128xf32>
    %26 = arith.mulf %21, %25 : vector<8x128xf32>
    %c0_11 = arith.constant 0 : index
    %c0_12 = arith.constant 0 : index
    %27 = vector.load %arg4[%c0_11, %c0_12] : memref<1x128xf32, #tpu.memory_space<vmem>>, vector<1x128xf32>
    %28 = vector.broadcast %27 : vector<1x128xf32> to vector<8x128xf32>
    %29 = arith.mulf %26, %28 : vector<8x128xf32>
    %c0_13 = arith.constant 0 : index
    %c0_14 = arith.constant 0 : index
    %30 = vector.load %arg5[%c0_13, %c0_14] : memref<1x128xf32, #tpu.memory_space<vmem>>, vector<1x128xf32>
    %31 = vector.broadcast %30 : vector<1x128xf32> to vector<8x128xf32>
    %32 = arith.addf %29, %31 : vector<8x128xf32>
    %33 = arith.truncf %32 : vector<8x128xf32> to vector<8x128xbf16>
    %34 = math.tanh %33 : vector<8x128xbf16>
    %c0_15 = arith.constant 0 : index
    %c0_16 = arith.constant 0 : index
    %35 = vector.load %arg6[%c0_15, %c0_16] : memref<128x128xbf16, #tpu.memory_space<vmem>>, vector<128x128xbf16>
    %cst_17 = arith.constant dense<0.000000e+00> : vector<8x128xf32>
    %36 = tpu.matmul %34, %35, %cst_17 {dimension_numbers = #tpu.dot_dimension_numbers<[1], [0], [0], [1], [0, 0, 1, 1], [], []>} : vector<8x128xbf16>, vector<128x128xbf16>, vector<8x128xf32> -> vector<8x128xf32>
    %c0_18 = arith.constant 0 : index
    %c0_19 = arith.constant 0 : index
    %37 = vector.load %arg7[%c0_18, %c0_19] : memref<1x128xf32, #tpu.memory_space<vmem>>, vector<1x128xf32>
    %38 = vector.broadcast %37 : vector<1x128xf32> to vector<8x128xf32>
    %39 = arith.addf %36, %38 : vector<8x128xf32>
    %40 = arith.truncf %39 : vector<8x128xf32> to vector<8x128xbf16>
    %cst_20 = arith.constant 0.000000e+00 : bf16
    %41 = vector.broadcast %cst_20 : bf16 to vector<8x128xbf16>
    %42 = arith.maximumf %40, %41 : vector<8x128xbf16>
    %c0_21 = arith.constant 0 : index
    %c0_22 = arith.constant 0 : index
    %43 = vector.load %arg8[%c0_21, %c0_22] : memref<128x128xbf16, #tpu.memory_space<vmem>>, vector<128x128xbf16>
    %cst_23 = arith.constant dense<0.000000e+00> : vector<8x128xf32>
    %44 = tpu.matmul %42, %43, %cst_23 {dimension_numbers = #tpu.dot_dimension_numbers<[1], [0], [0], [1], [0, 0, 1, 1], [], []>} : vector<8x128xbf16>, vector<128x128xbf16>, vector<8x128xf32> -> vector<8x128xf32>
    %c0_24 = arith.constant 0 : index
    %c0_25 = arith.constant 0 : index
    %45 = vector.load %arg9[%c0_24, %c0_25] : memref<1x128xf32, #tpu.memory_space<vmem>>, vector<1x128xf32>
    %46 = vector.broadcast %45 : vector<1x128xf32> to vector<8x128xf32>
    %47 = arith.addf %44, %46 : vector<8x128xf32>
    %48 = vector.extract_strided_slice %47 {offsets = [0, 0], sizes = [8, 8], strides = [1, 1]} : vector<8x128xf32> to vector<8x8xf32>
    %49 = tpu.iota {dimensions = array<i32: 1>} : vector<8x8xi32>
    %cst_26 = arith.constant -1.000000e+01 : f32
    %cst_27 = arith.constant 2.000000e+00 : f32
    %50 = vector.broadcast %cst_26 : f32 to vector<8x8xf32>
    %51 = arith.maximumf %50, %48 : vector<8x8xf32>
    %52 = vector.broadcast %cst_27 : f32 to vector<8x8xf32>
    %53 = arith.minimumf %52, %51 : vector<8x8xf32>
    %54 = math.exp %53 : vector<8x8xf32>
    %c4_i32 = arith.constant 4 : i32
    %55 = vector.broadcast %c4_i32 : i32 to vector<8x8xi32>
    %56 = arith.cmpi sge, %49, %55 : vector<8x8xi32>
    %57 = arith.select %56, %54, %48 : vector<8x8xi1>, vector<8x8xf32>
    %c0_28 = arith.constant 0 : index
    %c0_29 = arith.constant 0 : index
    %58 = vector.load %arg10[%c0_28, %c0_29] : memref<8x8xf32, #tpu.memory_space<vmem>>, vector<8x8xf32>
    tpu.vector_store %arg10[%c0_28, %c0_29], %57 {strides = array<i32>} : memref<8x8xf32, #tpu.memory_space<vmem>>, vector<8x8xf32>,
    return
  }
  func.func @transform_0(%arg0: i32) -> (i32, i32) {
    %c0_i32 = arith.constant 0 : i32
    %c0_i32_0 = arith.constant 0 : i32
    return %arg0, %c0_i32 : i32, i32
  }
  func.func @transform_1(%arg0: i32) -> (i32, i32) {
    %c0_i32 = arith.constant 0 : i32
    %c0_i32_0 = arith.constant 0 : i32
    %c0_i32_1 = arith.constant 0 : i32
    return %c0_i32, %c0_i32_0 : i32, i32
  }
  func.func @transform_2(%arg0: i32) -> (i32, i32) {
    %c0_i32 = arith.constant 0 : i32
    %c0_i32_0 = arith.constant 0 : i32
    %c0_i32_1 = arith.constant 0 : i32
    return %c0_i32, %c0_i32_0 : i32, i32
  }
  func.func @transform_3(%arg0: i32) -> (i32, i32) {
    %c0_i32 = arith.constant 0 : i32
    %c0_i32_0 = arith.constant 0 : i32
    %c0_i32_1 = arith.constant 0 : i32
    return %c0_i32, %c0_i32_0 : i32, i32
  }
  func.func @transform_4(%arg0: i32) -> (i32, i32) {
    %c0_i32 = arith.constant 0 : i32
    %c0_i32_0 = arith.constant 0 : i32
    %c0_i32_1 = arith.constant 0 : i32
    return %c0_i32, %c0_i32_0 : i32, i32
  }
  func.func @transform_5(%arg0: i32) -> (i32, i32) {
    %c0_i32 = arith.constant 0 : i32
    %c0_i32_0 = arith.constant 0 : i32
    %c0_i32_1 = arith.constant 0 : i32
    return %c0_i32, %c0_i32_0 : i32, i32
  }
  func.func @transform_6(%arg0: i32) -> (i32, i32) {
    %c0_i32 = arith.constant 0 : i32
    %c0_i32_0 = arith.constant 0 : i32
    %c0_i32_1 = arith.constant 0 : i32
    return %c0_i32, %c0_i32_0 : i32, i32
  }
  func.func @transform_7(%arg0: i32) -> (i32, i32) {
    %c0_i32 = arith.constant 0 : i32
    %c0_i32_0 = arith.constant 0 : i32
    %c0_i32_1 = arith.constant 0 : i32
    return %c0_i32, %c0_i32_0 : i32, i32
  }
  func.func @transform_8(%arg0: i32) -> (i32, i32) {
    %c0_i32 = arith.constant 0 : i32
    %c0_i32_0 = arith.constant 0 : i32
    %c0_i32_1 = arith.constant 0 : i32
    return %c0_i32, %c0_i32_0 : i32, i32
  }
  func.func @transform_9(%arg0: i32) -> (i32, i32) {
    %c0_i32 = arith.constant 0 : i32
    %c0_i32_0 = arith.constant 0 : i32
    return %arg0, %c0_i32 : i32, i32
  }
}

</mosaic_0001>

<bundles_post_ra>
// kernel: tpu_custom_call.1
= control target key start
LH: loop header
LB: loop body
LE: loop exit
PB: predicated region body
PF: predicated region fallthrough
CT: control target
= control target key end

     0   :  { %14 = vsyncpa [#allocation3], 0  ;;  %s849_s0 = inlined_call_operand.hbm [shape: f32[8,32], index: 0, kind: input, shape index: {}]   ;;  %s850_s1 = inlined_call_operand.hbm [shape: bf16[32,128], index: 1, kind: input, shape index: {}]   ;;  %s851_s2 = inlined_call_operand.vmem [shape: f32[1,128], index: 2, kind: input, shape index: {}]   ;;  %s852_s3 = inlined_call_operand.vmem [shape: f32[1,128], index: 3, kind: input, shape index: {}]   ;;  %s853_s4 = inlined_call_operand.vmem [shape: f32[1,128], index: 4, kind: input, shape index: {}]   ;;  %s854_s5 = inlined_call_operand.hbm [shape: bf16[128,128], index: 5, kind: input, shape index: {}]   ;;  %s855_s6 = inlined_call_operand.vmem [shape: f32[1,128], index: 6, kind: input, shape index: {}]   ;;  %s856_s7 = inlined_call_operand.hbm [shape: bf16[128,128], index: 7, kind: input, shape index: {}]   ;;  %s857_s8 = inlined_call_operand.vmem [shape: f32[1,128], index: 8, kind: input, shape index: {}]   ;;  %s858_s9 = inlined_call_operand.hbm [shape: f32[8,8], index: 9, kind: output, shape index: {}]  }
   0x1   :  { %15 = vsyncpa [#allocation6], 0 }
   0x2   :  { %16 = vsyncpa [#allocation9], 0 }
   0x3   :  { %17 = vsyncpa [#allocation4], 0  ;;  %s684_s30 = smov [#allocation5]   ;;  %s566_s13 = scalar_lea.hbm %s850_s1, 256 }
   0x4   :  { %s33_s10 = sshll.u32 %s684_s30, 4  ;;  %p567_p0 = scmp.ne.s32.totalorder %s850_s1, %s566_s13  ;;  %s34_s10 = int_to_ptr.vmem [resolvable:$true] %s33_s10 }
   0x5   :  { %p570_p1 = scmp.lt.u32.totalorder %s566_s13, %s850_s1 }
   0x7   :  { %p572_p2 = pnand %p570_p1, %p567_p0 }
   0x9   :  { %575 = shalt.err (!%p572_p2)
}
   0xa   :  { %s576_s18 = scalar_lea.vmem %s34_s10, 256  ;;  %p581_p4 = scmp.lt.s32.totalorder %s34_s10, %s34_s10 }
   0xb   :  { %p577_p3 = scmp.ne.s32.totalorder %s34_s10, %s576_s18  ;;  %p582_p5 = scmp.lt.s32.totalorder %s576_s18, %s576_s18 }
   0xd   :  { %p583_p6 = por %p582_p5, %p581_p4 }
   0xf   :  { %p584_p7 = pnand %p583_p6, %p577_p3 }
  0x11   :  { %587 = shalt.err (!%p584_p7)
}
  0x12   :  { %s685_s19 = smov 64   ;;  %s686_s20 = smov 4  }
  0x13   :  { %39 = dma.hbm_to_vmem [thread:$0]  %s850_s1, 256, %s34_s10, [#allocation6], %s685_s19, %s685_s19, %s686_s20  }
  0x14   :  { %s687_s23 = smov [#allocation2]   ;;  %s688_s25 = smov [#allocation7]  }
  0x15   :  { %s24_s24 = sshll.u32 %s687_s23, 4  ;;  %s51_s26 = sshll.u32 %s688_s25, 4  ;;  %s25_s24 = int_to_ptr.vmem [resolvable:$true] %s24_s24  ;;  %s52_s26 = int_to_ptr.vmem [resolvable:$true] %s51_s26 }
  0x16   :  { %s588_s29 = scalar_lea.hbm %s849_s0, 128 }
  0x17   :  { %p589_p8 = scmp.ne.s32.totalorder %s849_s0, %s588_s29  ;;  %p592_p9 = scmp.lt.u32.totalorder %s588_s29, %s849_s0 }
  0x19   :  { %p594_p10 = pnand %p592_p9, %p589_p8 }
  0x1b   :  { %597 = shalt.err (!%p594_p10)
}
  0x1c   :  { %s598_s1 = scalar_lea.vmem %s25_s24, 128  ;;  %p603_p12 = scmp.lt.s32.totalorder %s25_s24, %s25_s24 }
  0x1d   :  { %p599_p11 = scmp.ne.s32.totalorder %s25_s24, %s598_s1  ;;  %p604_p13 = scmp.lt.s32.totalorder %s598_s1, %s598_s1 }
  0x1f   :  { %p605_p0 = por %p604_p13, %p603_p12 }
  0x21   :  { %p606_p1 = pnand %p605_p0, %p599_p11 }
  0x23   :  { %609 = shalt.err (!%p606_p1)
}
  0x24   :  { %27 = dma.hbm_to_vmem [thread:$0]  %s849_s0, 128, %s25_s24, [#allocation3]  }
  0x25   :  { %s610_s17 = scalar_lea.hbm %s854_s5, 1024 }
  0x26   :  { %p611_p2 = scmp.ne.s32.totalorder %s854_s5, %s610_s17  ;;  %p614_p3 = scmp.lt.u32.totalorder %s610_s17, %s854_s5 }
  0x28   :  { %p616_p4 = pnand %p614_p3, %p611_p2 }
  0x2a   :  { %619 = shalt.err (!%p616_p4)
}
  0x2b   :  { %s620_s25 = scalar_lea.vmem %s52_s26, 1024  ;;  %p625_p6 = scmp.lt.s32.totalorder %s52_s26, %s52_s26 }
  0x2c   :  { %p621_p5 = scmp.ne.s32.totalorder %s52_s26, %s620_s25  ;;  %p626_p7 = scmp.lt.s32.totalorder %s620_s25, %s620_s25 }
  0x2e   :  { %p627_p8 = por %p626_p7, %p625_p6 }
  0x30   :  { %p628_p9 = pnand %p627_p8, %p621_p5 }
  0x32   :  { %631 = shalt.err (!%p628_p9)
}
  0x33   :  { %57 = dma.hbm_to_vmem [thread:$0]  %s854_s5, 1024, %s52_s26, [#allocation6], %s685_s19, %s685_s19, %s686_s20  }
  0x34   :  { %s689_s27 = smov [#allocation8]   ;;  %s632_s11 = scalar_lea.hbm %s856_s7, 1024 }
  0x35   :  { %s65_s28 = sshll.u32 %s689_s27, 4  ;;  %p633_p10 = scmp.ne.s32.totalorder %s856_s7, %s632_s11  ;;  %s66_s28 = int_to_ptr.vmem [resolvable:$true] %s65_s28 }
  0x36   :  { %p636_p11 = scmp.lt.u32.totalorder %s632_s11, %s856_s7 }
  0x38   :  { %p638_p12 = pnand %p636_p11, %p633_p10 }
  0x3a   :  { %641 = shalt.err (!%p638_p12)
}
  0x3b   :  { %s642_s14 = scalar_lea.vmem %s66_s28, 1024  ;;  %p647_p0 = scmp.lt.s32.totalorder %s66_s28, %s66_s28 }
  0x3c   :  { %p643_p13 = scmp.ne.s32.totalorder %s66_s28, %s642_s14  ;;  %p648_p1 = scmp.lt.s32.totalorder %s642_s14, %s642_s14 }
  0x3e   :  { %p649_p2 = por %p648_p1, %p647_p0 }
  0x40   :  { %p650_p3 = pnand %p649_p2, %p643_p13 }
  0x42   :  { %653 = shalt.err (!%p650_p3)
}
  0x43   :  { %71 = dma.hbm_to_vmem [thread:$0]  %s856_s7, 1024, %s66_s28, [#allocation9], %s685_s19, %s685_s19, %s686_s20  }
  0x44   :  { %676 = dma.done.wait [#allocation3], 128  }
  0x45   :  { %677 = vsyncadd [#allocation3], 4294967168 }
  0x46   :  { %678 = dma.done.wait [#allocation6], 1280  }
  0x47   :  { %679 = vsyncadd [#allocation6], 4294966016 }
  0x48   :  { %680 = dma.done.wait [#allocation9], 1024  }
  0x49   :  { %681 = vsyncadd [#allocation9], 4294966272  ;;  %v690_v0 = vmov 0.0   ;;  %vm691_vm0 = vmmov 0   ;;  %v542_v1 = vld [vmem:[#allocation5] sm:$0xff]   ;;  %v543_v2 = vld [vmem:[#allocation5 + $0x8] sm:$0xff]   ;;  %v412_v63 = vlaneseq }
  0x4a   :  { %484 = vmatprep.subr.bf16.mxu0 %v690_v0  ;;  %488 = vmatprep.mubr.msk.bf16.mxu0 %vm691_vm0, %v690_v0  ;;  %v87_v3 = vld [vmem:[#allocation2] sm:$0xff]  ;;  %vm112_vm1 = vcmask 261120   ;;  %v544_v12 = vld [vmem:[#allocation7] sm:$0xff]   ;;  %v546_v14 = vld [vmem:[#allocation7 + $0x10] sm:$0xff]   ;;  %v692_v52 = vmov 0   ;;  %vm420_vm3 = vcmask 64512  }
  0x4b   :  { %492 = vmatprep.subr.bf16.mxu1 %v690_v0  ;;  %508 = vmatprep.mubr.msk.bf16.mxu1 %vm691_vm0, %v690_v0  ;;  %v88_v4 = vpack.c.bf16 %v87_v3, %v87_v3  ;;  %v439_v5 = vld [vmem:[%s851_s2] ss:$0 sm:$0xff]  ;;  %v547_v15 = vld [vmem:[#allocation7 + $0x18] sm:$0xff]   ;;  %v548_v16 = vld [vmem:[#allocation7 + $0x20] sm:$0xff]  }
  0x4c   :  { %485 = vmatpush3.bf16.msra.mxu0 %v542_v1  ;;  %493 = vmatpush3.bf16.msra.mxu1 %v544_v12  ;;  %v545_v13 = vld [vmem:[#allocation7 + $0x8] sm:$0xff]   ;;  %v550_v18 = vld [vmem:[#allocation7 + $0x30] sm:$0xff]   ;;  %v551_v19 = vld [vmem:[#allocation7 + $0x38] sm:$0xff]  }
  0x4d   :  { %486 = vmatprep.subr.bf16.mxu0 %v690_v0  ;;  %494 = vmatprep.subr.bf16.mxu1 %v690_v0  ;;  %v549_v17 = vld [vmem:[#allocation7 + $0x28] sm:$0xff]   ;;  %v552_v20 = vld [vmem:[#allocation8] sm:$0xff]   ;;  %v554_v22 = vld [vmem:[#allocation8 + $0x10] sm:$0xff]  }
  0x4e   :  { %v553_v21 = vld [vmem:[#allocation8 + $0x8] sm:$0xff]   ;;  %v555_v23 = vld [vmem:[#allocation8 + $0x18] sm:$0xff]   ;;  %v556_v24 = vld [vmem:[#allocation8 + $0x20] sm:$0xff]  }
  0x4f   :  { %v557_v25 = vld [vmem:[#allocation8 + $0x28] sm:$0xff]   ;;  %v558_v43 = vld [vmem:[#allocation8 + $0x30] sm:$0xff]   ;;  %v559_v44 = vld [vmem:[#allocation8 + $0x38] sm:$0xff]  }
  0x50   :  { %487 = vmatpush3.bf16.msra.mxu0 %v543_v2  ;;  %495 = vmatpush3.bf16.msra.mxu1 %v545_v13  ;;  %v443_v36 = vld [vmem:[%s852_s3] ss:$0 sm:$0xff] }
  0x51   :  { %512 = vmatprep.subr.bf16.mxu0 %v690_v0  ;;  %496 = vmatprep.subr.bf16.mxu1 %v690_v0  ;;  %v444_v38 = vld [vmem:[%s853_s4] ss:$0 sm:$0xff] }
  0x52   :  { %v445_v45 = vld [vmem:[%s855_s6] ss:$0 sm:$0xff]  ;;  %s693_s6 = smov [#allocation10]  }
  0x53   :  { %489 = vmatmul.mubr.msk.bf16.vlgmr.msra.gmra.mrb[0].mxu0 %vm112_vm1, %v88_v4  ;;  %v454_v54 = vld [vmem:[%s857_s8] ss:$0 sm:$0xff]  ;;  %s428_s21 = sshll.u32 %s693_s6, 4  ;;  %s429_s21 = int_to_ptr.vmem [resolvable:$true] %s428_s21 }
  0x54   :  { %528 = vmatprep.mubr.msk.bf16.mxu0 %vm691_vm0, %v690_v0  ;;  %497 = vmatpush3.bf16.msra.mxu1 %v546_v14  ;;  %s654_s8 = scalar_lea.vmem %s429_s21, 128  ;;  %p659_p5 = scmp.lt.s32.totalorder %s429_s21, %s429_s21 }
  0x55   :  { %498 = vmatprep.subr.bf16.mxu1 %v690_v0  ;;  %513 = vmatpush3.bf16.msra.mxu0 %v552_v20  ;;  %p655_p4 = scmp.ne.s32.totalorder %s429_s21, %s654_s8  ;;  %p660_p6 = scmp.lt.s32.totalorder %s654_s8, %s654_s8 }
  0x56   :  { %514 = vmatprep.subr.bf16.mxu0 %v690_v0 }
  0x57   :  { %p661_p7 = por %p660_p6, %p659_p5 }
  0x58   :  { %499 = vmatpush3.bf16.msra.mxu1 %v547_v15 }
  0x59   :  { %500 = vmatprep.subr.bf16.mxu1 %v690_v0  ;;  %515 = vmatpush3.bf16.msra.mxu0 %v553_v21  ;;  %p662_p8 = pnand %p661_p7, %p655_p4 }
  0x5a   :  { %516 = vmatprep.subr.bf16.mxu0 %v690_v0 }
  0x5c   :  { %501 = vmatpush3.bf16.msra.mxu1 %v548_v16 }
  0x5d   :  { %502 = vmatprep.subr.bf16.mxu1 %v690_v0  ;;  %517 = vmatpush3.bf16.msra.mxu0 %v554_v22 }
  0x5e   :  { %518 = vmatprep.subr.bf16.mxu0 %v690_v0 }
  0x60   :  { %503 = vmatpush3.bf16.msra.mxu1 %v549_v17 }
  0x61   :  { %504 = vmatprep.subr.bf16.mxu1 %v690_v0  ;;  %519 = vmatpush3.bf16.msra.mxu0 %v555_v23 }
  0x62   :  { %520 = vmatprep.subr.bf16.mxu0 %v690_v0 }
  0x64   :  { %505 = vmatpush3.bf16.msra.mxu1 %v550_v18 }
  0x65   :  { %506 = vmatprep.subr.bf16.mxu1 %v690_v0  ;;  %521 = vmatpush3.bf16.msra.mxu0 %v556_v24 }
  0x66   :  { %522 = vmatprep.subr.bf16.mxu0 %v690_v0 }
  0x68   :  { %507 = vmatpush3.bf16.msra.mxu1 %v551_v19 }
  0x69   :  { %523 = vmatpush3.bf16.msra.mxu0 %v557_v25 }
  0x6a   :  { %524 = vmatprep.subr.bf16.mxu0 %v690_v0 }
  0x6d   :  { %525 = vmatpush3.bf16.msra.mxu0 %v558_v43 }
  0x6e   :  { %526 = vmatprep.subr.bf16.mxu0 %v690_v0  ;;  %v413_v0 = vand.u32 127, %v412_v63 }
  0x70   :  { %vm418_vm2 = vcmp.ge.s32.totalorder %v413_v0, 4 }
  0x71   :  { %527 = vmatpush3.bf16.msra.mxu0 %v559_v44 }
 0x126   :  { %v150_v6 = vpop.f32.mrb[0].mxu0 }
 0x127   :  { %v151_v7 = vadd.f32 %v439_v5, %v150_v6  ;;  %v490_v8 = vpop.f32.mrb[1].mxu0 }
 0x128   :  { %v153_v9 = vpop.f32.mrb[2].mxu0 }
 0x129   :  { %156 = vadd.xlane.f32.xlu0 %v151_v7  ;;  %v491_v10 = vpop.f32.mrb[3].mxu0  ;;  %v159_v11 = vmul.f32 %v151_v7, %v151_v7 }
 0x12d   :  { %160 = vadd.xlane.f32.xlu0 %v159_v11 }
 0x1b6   :  { %v157_v26 = vpop.xlane.xlu0 %156 }
 0x1b7   :  { %v158_v27 = vmul.f32 0.03125, %v157_v26 }
 0x1b9   :  { %v163_v29 = vmul.f32 %v158_v27, %v158_v27  ;;  %v166_v34 = vsub.f32 %v151_v7, %v158_v27 }
 0x1ba   :  { %v161_v28 = vpop.xlane.xlu0 %160 }
 0x1bb   :  { %v162_v30 = vmul.f32 0.03125, %v161_v28 }
 0x1bd   :  { %v164_v31 = vsub.f32 %v162_v30, %v163_v29 }
 0x1bf   :  { %v165_v32 = vmax.f32 %v164_v31, 0.0 }
 0x1c1   :  { %v167_v33 = vadd.f32 1e-05, %v165_v32 }
 0x1c3   :  { %560 = vrsqrt.f32 %v167_v33 }
 0x1cd   :  { %v561_v35 = vpop.eup %560 }
 0x1ce   :  { %v169_v37 = vmul.f32 %v561_v35, %v166_v34 }
 0x1d0   :  { %v177_v39 = vmul.f32 %v443_v36, %v169_v37 }
 0x1d2   :  { %v185_v40 = vadd.f32 %v444_v38, %v177_v39 }
 0x1d4   :  { %v186_v41 = vpack.c.bf16 %v185_v40, %v185_v40 }
 0x1d6   :  { %562 = vtanh.bf16 %v186_v41 }
 0x1e1   :  { %v563_v42 = vpop.eup %562 }
 0x1e2   :  { %509 = vmatmul.mubr.bf16.vlgmr.msra.gmra.mrb[0].mxu1 %v563_v42 }
 0x2b5   :  { %v293_v46 = vpop.f32.mrb[0].mxu1 }
 0x2b6   :  { %v294_v47 = vadd.f32 %v445_v45, %v293_v46  ;;  %v510_v48 = vpop.f32.mrb[1].mxu1 }
 0x2b7   :  { %v296_v49 = vpop.f32.mrb[2].mxu1 }
 0x2b8   :  { %v299_v50 = vpack.c.bf16 %v294_v47, %v294_v47  ;;  %v511_v51 = vpop.f32.mrb[3].mxu1 }
 0x2ba   :  { %v300_v53 = vmax.bf16 %v692_v52, %v299_v50 }
 0x2bc   :  { %529 = vmatmul.mubr.bf16.vlgmr.msra.gmra.mrb[4].mxu0 %v300_v53 }
 0x38f   :  { %v406_v55 = vpop.f32.mrb[4].mxu0 }
 0x390   :  { %v407_v56 = vadd.f32 %v454_v54, %v406_v55  ;;  %v530_v57 = vpop.f32.mrb[5].mxu0 }
 0x391   :  { %v409_v58 = vpop.f32.mrb[6].mxu0 }
 0x392   :  { %v414_v59 = vmax.f32 %v407_v56, -10.0  ;;  %v531_v60 = vpop.f32.mrb[7].mxu0 }
 0x394   :  { %v415_v61 = vmin.f32 %v414_v59, 2.0 }
 0x396   :  { %v416_v62 = vmul.f32 1.442695, %v415_v61 }
 0x398   :  { %564 = vpow2.f32 %v416_v62 }
 0x3a2   :  { %v565_v1 = vpop.eup %564 }
 0x3a3   :  { %v419_v2 = vsel %vm418_vm2, %v565_v1, %v407_v56 }
 0x3a4   :  { %421 = vst.msk [vmem:[#allocation10] sm:$0xff] %vm420_vm3, %v419_v2 }
 0x3a5   :  { %665 = shalt.err (!%p662_p8)
}
 0x3a6   :  { %s666_s25 = scalar_lea.hbm %s858_s9, 128 }
 0x3a7   :  { %p667_p9 = scmp.ne.s32.totalorder %s858_s9, %s666_s25  ;;  %p670_p10 = scmp.lt.u32.totalorder %s666_s25, %s858_s9 }
 0x3a9   :  { %p672_p11 = pnand %p670_p10, %p667_p9 }
 0x3ab   :  { %675 = shalt.err (!%p672_p11)
}
 0x3ac   :  { %431 = dma.vmem_to_hbm [thread:$0]  %s429_s21, 128, %s858_s9, [#allocation4]  }
 0x3ad   :  { %682 = dma.done.wait [#allocation4], 128  }
 0x3ae   :  { %683 = vsyncadd [#allocation4], 4294967168 }
 0x3af   :  { %435 = vsyncpa [#allocation3], 1 }
 0x3b0   :  { %436 = vsyncpa [#allocation6], 1 }
 0x3b1   :  { %437 = vsyncpa [#allocation9], 1 }
 0x3b2   :  { %438 = vsyncpa [#allocation4], 1 }

</bundles_post_ra>
